<compile_context>
chip_gen: v7x
topology: tpu7x:2x2x1
jax: 0.10.0
libtpu: 0.0.40
codegen_flags: <defaults>
</compile_context>

<pallas_src>
import functools

import jax
import jax.numpy as jnp
from jax.experimental import pallas as pl
from jax.experimental.pallas import tpu as pltpu

_LANE_CANDIDATES = (512, 256, 128)      # lane-dense last dims (multiples of 128)
_TARGET_BLOCK_BYTES = 4 * 1024 * 1024   # ~4 MiB per block, dtype-independent
_VMEM_LIMIT_BYTES = 48 * 1024 * 1024    # safe on v5e/v6e (128 MiB) and v7x (64 MiB)
_MIN_PALLAS_ELEMENTS = 256 * 1024       # below this, plain XLA is strictly faster


def _scale_kernel(factor_ref, x_ref, o_ref, *, max_value):
    # factor_ref: (1,) f32 scalar parameter, resident in SMEM for the whole grid.
    f = jnp.clip(factor_ref[0], 0.0, jnp.float32(max_value))
    # Multiply in f32 (matches PyTorch's f32-parameter promotion), store in x dtype.
    o_ref[...] = (x_ref[...].astype(jnp.float32) * f).astype(o_ref.dtype)


def _xla_scale(x, factor_f32, max_value):
    f = jnp.clip(factor_f32[0], 0.0, jnp.float32(max_value))
    return (x.astype(jnp.float32) * f).astype(x.dtype)


def scale_factor_forward(x, factor, max_value=100, *,
                         min_pallas_elements=_MIN_ALLAS if False else _MIN_PALLAS_ELEMENTS):
    """ScaleFactor.forward: x * clamp(factor, 0, max_value).

    x: any-shape float array. factor: scalar (or shape-(1,)) learnable parameter.
    """
    # Defensive: the clamp / SMEM scalar path assumes an f32 parameter.
    factor_f32 = jnp.asarray(factor, dtype=jnp.float32).reshape((1,))

    total = x.size
    if total == 0:
        return x

    # Small-input fast path: custom-call overhead dominates; let XLA fuse it.
    if total < min_pallas_elements:
        return _xla_scale(x, factor_f32, max_value)

    # Pick the largest lane width that divides the flat size (zero-copy view).
    lane = next((l for l in _LANE_CANDIDATES if total % l == 0), None)
    if lane is None:
        # Rare odd size: XLA already streams this at roofline; don't pay the
        # extra read+write of the whole tensor that padding would cost.
        return _xla_scale(x, factor_f32, max_value)

    orig_shape = x.shape
    rows = total // lane
    x2d = x.reshape(rows, lane)

    # Byte-constant block sizing (~4 MiB), rows a multiple of the dtype's
    # sublane packing (f32: 8, bf16: 16, int8/fp8: 32).
    itemsize = jnp.dtype(x.dtype).itemsize
    sublane_mult = 8 * max(1, 4 // itemsize)
    block_rows = _TARGET_BLOCK_BYTES // (lane * itemsize)
    block_rows = max(sublane_mult, (block_rows // sublane_mult) * sublane_mult)
    if rows <= block_rows:
        block_rows = rows  # full-extent block is always legal
    grid = (pl.cdiv(rows, block_rows),)

    kernel = functools.partial(_scale_kernel, max_value=max_value)

    out2d = pl.pallas_call(
        kernel,
        out_shape=jax.ShapeDtypeStruct(x2d.shape, x2d.dtype),
        grid=grid,
        in_specs=[
            pl.BlockSpec(memory_space=pltpu.MemorySpace.SMEM),   # scalar factor
            pl.BlockSpec((block_rows, lane), lambda i: (i, 0)),  # streamed tile
        ],
        out_specs=pl.BlockSpec((block_rows, lane), lambda i: (i, 0)),
        compiler_params=pltpu.CompilerParams(
            dimension_semantics=("parallel",),
            vmem_limit_bytes=_VMEM_LIMIT_BYTES,
        ),
        cost_estimate=pl.CostEstimate(
            flops=total,
            transcendentals=0,
            bytes_accessed=2 * total * itemsize + 4,
        ),
    )(factor_f32, x2d)

    return out2d.reshape(orig_shape)


if __name__ == "__main__":
    key = jax.random.PRNGKey(0)
    # NCHW example input, small shapes (batch=2, channels=4, spatial=16).
    x = jax.random.normal(key, (2, 4, 16, 16), dtype=jnp.float32)

    # Deterministic parameter init: nn.Parameter(torch.tensor(1.0))
    factor = jnp.array([1.0], dtype=jnp.float32)
    max_value = 100

    ref = x * jnp.clip(factor[0], 0.0, float(max_value))

    # Force the Pallas path on the small demo input (the default threshold
    # would route a tensor this small to the XLA fast path).
    out = scale_factor_forward(x, factor, max_value=max_value,
                               min_pallas_elements=0)
    out = jax.block_until_ready(out)
    assert out.shape == x.shape and out.dtype == x.dtype
    assert jnp.allclose(out, ref, atol=1e-6, rtol=1e-6)

    # Default path (small input -> plain XLA fast path) must also match.
    out_fast = jax.block_until_ready(
        scale_factor_forward(x, factor, max_value=max_value))
    assert jnp.allclose(out_fast, ref, atol=1e-6, rtol=1e-6)

    print("KERNEL_OK")
</pallas_src>

<mosaic_0001>
module attributes {stable_mosaic.version = 11 : i64} {
  func.func @_scale_kernel(%arg0: i32, %arg1: memref<1xf32, #tpu.memory_space<smem>>, %arg2: memref<4x512xf32, #tpu.memory_space<vmem>>, %arg3: memref<4x512xf32, #tpu.memory_space<vmem>>) attributes {dimension_semantics = [#tpu.dimension_semantics<parallel>], iteration_bounds = array<i64: 1>, scalar_prefetch = 0 : i64, scratch_operands = 0 : i64, tpu.core_type = #tpu.core_type<tc>, window_params = [{transform_indices = @transform_0, window_bounds = array<i64: 1>}, {transform_indices = @transform_1, window_bounds = array<i64: 4, 512>}, {transform_indices = @transform_2, window_bounds = array<i64: 4, 512>}]} {
    %c0 = arith.constant 0 : index
    %0 = memref.load %arg1[%c0] : memref<1xf32, #tpu.memory_space<smem>>
    %cst = arith.constant 0.000000e+00 : f32
    %cst_0 = arith.constant 1.000000e+02 : f32
    %1 = arith.maximumf %cst, %0 : f32
    %2 = arith.minimumf %cst_0, %1 : f32
    %c0_1 = arith.constant 0 : index
    %c0_2 = arith.constant 0 : index
    %3 = vector.load %arg2[%c0_1, %c0_2] : memref<4x512xf32, #tpu.memory_space<vmem>>, vector<4x512xf32>
    %4 = vector.broadcast %2 : f32 to vector<4x512xf32>
    %5 = arith.mulf %3, %4 : vector<4x512xf32>
    %c0_3 = arith.constant 0 : index
    %c0_4 = arith.constant 0 : index
    %6 = vector.load %arg3[%c0_3, %c0_4] : memref<4x512xf32, #tpu.memory_space<vmem>>, vector<4x512xf32>
    tpu.vector_store %arg3[%c0_3, %c0_4], %5 {strides = array<i32>} : memref<4x512xf32, #tpu.memory_space<vmem>>, vector<4x512xf32>,
    return
  }
  func.func @transform_0(%arg0: i32) -> i32 {
    %c0_i32 = arith.constant 0 : i32
    %c0_i32_0 = arith.constant 0 : i32
    return %c0_i32 : i32
  }
  func.func @transform_1(%arg0: i32) -> (i32, i32) {
    %c0_i32 = arith.constant 0 : i32
    %c0_i32_0 = arith.constant 0 : i32
    return %arg0, %c0_i32 : i32, i32
  }
  func.func @transform_2(%arg0: i32) -> (i32, i32) {
    %c0_i32 = arith.constant 0 : i32
    %c0_i32_0 = arith.constant 0 : i32
    return %arg0, %c0_i32 : i32, i32
  }
}

</mosaic_0001>

<bundles_post_ra>
// kernel: tpu_custom_call.1
= control target key start
LH: loop header
LB: loop body
LE: loop exit
PB: predicated region body
PF: predicated region fallthrough
CT: control target
= control target key end

     0   :  { %8 = vsyncpa [#allocation4], 0  ;;  %s148_s0 = inlined_call_operand.<no memory space> [shape: f32[1], index: 0, kind: input, shape index: {}]   ;;  %s149_s1 = inlined_call_operand.hbm [shape: f32[4,512], index: 1, kind: input, shape index: {}]   ;;  %s150_s2 = inlined_call_operand.hbm [shape: f32[4,512], index: 2, kind: output, shape index: {}]  }
   0x1   :  { %9 = vsyncpa [#allocation5], 0  ;;  %s102_s9 = smov [#allocation3]   ;;  %s54_s13 = scalar_lea.hbm %s149_s1, 256 }
   0x2   :  { %s18_s10 = sshll.u32 %s102_s9, 4  ;;  %p55_p0 = scmp.ne.s32.totalorder %s149_s1, %s54_s13  ;;  %s19_s10 = int_to_ptr.vmem [resolvable:$true] %s18_s10 }
   0x3   :  { %p58_p1 = scmp.lt.u32.totalorder %s54_s13, %s149_s1 }
   0x5   :  { %p60_p2 = pnand %p58_p1, %p55_p0 }
   0x7   :  { %63 = shalt.err (!%p60_p2)
}
   0x8   :  { %s64_s18 = scalar_lea.vmem %s19_s10, 256  ;;  %p69_p4 = scmp.lt.s32.totalorder %s19_s10, %s19_s10 }
   0x9   :  { %p65_p3 = scmp.ne.s32.totalorder %s19_s10, %s64_s18  ;;  %p70_p5 = scmp.lt.s32.totalorder %s64_s18, %s64_s18 }
   0xb   :  { %p71_p6 = por %p70_p5, %p69_p4 }
   0xd   :  { %p72_p7 = pnand %p71_p6, %p65_p3 }
   0xf   :  { %75 = shalt.err (!%p72_p7)
}
  0x10   :  { %21 = dma.hbm_to_vmem [thread:$0]  %s149_s1, 256, %s19_s10, [#allocation4]  }
  0x11   :  { %98 = dma.done.wait [#allocation4], 256  }
  0x12   :  { %99 = vsyncadd [#allocation4], 4294967040  ;;  %s103_s21 = smov 0.0   ;;  %s104_s25 = smov 100.0   ;;  %v28_v1 = vld [vmem:[#allocation3] sm:$0xff]  ;;  %v29_v2 = vld [vmem:[#allocation3 + $0x8] sm:$0xff] }
  0x13   :  { %s26_s24 = smax.f32 %s103_s21, %s148_s0  ;;  %s105_s27 = smov [#allocation6]  }
  0x14   :  { %s27_s26 = smin.f32 %s104_s25, %s26_s24  ;;  %s41_s28 = sshll.u32 %s105_s27, 4  ;;  %s42_s28 = int_to_ptr.vmem [resolvable:$true] %s41_s28 }
  0x15   :  { %v30_v0 = vstv %s27_s26  ;;  %s76_s1 = scalar_lea.vmem %s42_s28, 256  ;;  %p81_p9 = scmp.lt.s32.totalorder %s42_s28, %s42_s28 }
  0x16   :  { %v31_v3 = vmul.f32 %v30_v0, %v28_v1  ;;  %v32_v4 = vmul.f32 %v30_v0, %v29_v2  ;;  %p77_p8 = scmp.ne.s32.totalorder %s42_s28, %s76_s1  ;;  %p82_p10 = scmp.lt.s32.totalorder %s76_s1, %s76_s1 }
  0x18   :  { %33 = vst [vmem:[#allocation6] sm:$0xff] %v31_v3  ;;  %34 = vst [vmem:[#allocation6 + $0x8] sm:$0xff] %v32_v4  ;;  %p83_p11 = por %p82_p10, %p81_p9 }
  0x1a   :  { %p84_p12 = pnand %p83_p11, %p77_p8 }
  0x1c   :  { %87 = shalt.err (!%p84_p12)
}
  0x1d   :  { %s88_s30 = scalar_lea.hbm %s150_s2, 256 }
  0x1e   :  { %p89_p13 = scmp.ne.s32.totalorder %s150_s2, %s88_s30  ;;  %p92_p0 = scmp.lt.u32.totalorder %s88_s30, %s150_s2 }
  0x20   :  { %p94_p1 = pnand %p92_p0, %p89_p13 }
  0x22   :  { %97 = shalt.err (!%p94_p1)
}
  0x23   :  { %44 = dma.vmem_to_hbm [thread:$0]  %s42_s28, 256, %s150_s2, [#allocation5]  }
  0x24   :  { %100 = dma.done.wait [#allocation5], 256  }
  0x25   :  { %101 = vsyncadd [#allocation5], 4294967040 }
  0x26   :  { %48 = vsyncpa [#allocation4], 1 }
  0x27   :  { %49 = vsyncpa [#allocation5], 1 }

</bundles_post_ra>
